<compile_context>
chip_gen: v6e
topology: v6e:2x2x1
jax: 0.10.0
libtpu: 0.0.40
codegen_flags: <defaults>
</compile_context>

<pallas_src>
import functools

import jax
import jax.numpy as jnp
from jax.experimental import pallas as pl
from jax.experimental.pallas import tpu as pltpu

IGNORE_INDEX = -100


def _round_up(x, m):
    return (x + m - 1) // m * m


def _tile_config():
    """Per-TPU-generation tile sizes / VMEM budget for the MLM CE kernel."""
    kind = ""
    try:
        kind = jax.devices()[0].device_kind.lower()
    except Exception:  # pragma: no cover - defensive
        pass
    if "v6" in kind:
        # 128 MiB VMEM, 2x256 MXU: big token tile + 2048-wide vocab steps.
        return dict(tile_tokens=768, tile_vocab=2048, vmem_limit=96 * 1024 * 1024)
    if "v5" in kind:
        # 128 MiB VMEM, 128x128 MXU: tt=512 already MXU-bound, keep tv=1024.
        return dict(tile_tokens=512, tile_vocab=1024, vmem_limit=96 * 1024 * 1024)
    # v7x (64 MiB VMEM per TC) and unknown chips: conservative budget that
    # still sits above the bf16 HBM ridge (~310 FLOP/B) at tt=512.
    return dict(tile_tokens=512, tile_vocab=1024, vmem_limit=48 * 1024 * 1024)


# --------------------------------------------------------------------------
# Kernel 1: fused LM-head projection + online-logsumexp cross-entropy (MLM)
# --------------------------------------------------------------------------
def _mlm_ce_kernel(h_ref, w_ref, lab_ref, out_ref, m_sc, l_sc, p_sc,
                   *, v_actual, tile_v, needs_vocab_mask):
    kv = pl.program_id(1)

    @pl.when(kv == 0)
    def _():
        m_sc[...] = jnp.full_like(m_sc, -jnp.inf)
        l_sc[...] = jnp.zeros_like(l_sc)
        p_sc[...] = jnp.zeros_like(p_sc)

    # (tt, H) @ (H, tv) -> (tt, tv) logits, f32 accumulation on the MXU
    logits = jnp.dot(h_ref[...], w_ref[...], preferred_element_type=jnp.float32)

    # (1, tv) lane iota reused for both the padded-vocab mask and label pick.
    lane = jax.lax.broadcasted_iota(jnp.int32, (1, tile_v), 1)

    if needs_vocab_mask:
        # Only the LAST vocab tile can contain padded columns, so tile 0 always
        # has at least one finite column -> exp(m_prev - m_new) stays NaN-safe.
        valid_col = (lane + kv * tile_v) < v_actual            # (1, tv)
        logits = jnp.where(valid_col, logits, -jnp.inf)

    lab = lab_ref[...]                                          # (tt, 1) int32

    # online logsumexp over the vocab axis
    m_prev = m_sc[...]
    m_new = jnp.maximum(m_prev, jnp.max(logits, axis=-1, keepdims=True))
    l_sc[...] = (l_sc[...] * jnp.exp(m_prev - m_new)
                 + jnp.sum(jnp.exp(logits - m_new), axis=-1, keepdims=True))
    # gather the label logit if it lives in this vocab tile
    hit = lane == (lab - kv * tile_v)                           # (tt, tv) bool
    p_sc[...] += jnp.sum(jnp.where(hit, logits, 0.0), axis=-1, keepdims=True)
    m_sc[...] = m_new

    @pl.when(kv == pl.num_programs(1) - 1)
    def _():
        valid = (lab != IGNORE_INDEX).astype(jnp.float32)       # (tt, 1)
        nll = (m_sc[...] + jnp.log(l_sc[...]) - p_sc[...]) * valid
        # lane-dense unmasked store of the per-token-tile partial sum
        out_ref[...] = jnp.full(out_ref.shape, jnp.sum(nll), dtype=jnp.float32)


def fused_lm_head_cross_entropy(hidden, lm_head_w, labels, *,
                                tile_tokens=None, tile_vocab=None,
                                vmem_limit=None):
    """hidden: (T, H) bf16, lm_head_w: (H, V) bf16, labels: (T,) int32.

    Unshifted (true MLM) cross-entropy with ignore_index=-100, mean over valid
    tokens.  Returns 0 (not NaN) when every label is IGNORE_INDEX.
    """
    cfg = _tile_config()
    tile_tokens = cfg["tile_tokens"] if tile_tokens is None else tile_tokens
    tile_vocab = cfg["tile_vocab"] if tile_vocab is None else tile_vocab
    vmem_limit = cfg["vmem_limit"] if vmem_limit is None else vmem_limit

    T, H = hidden.shape
    V = lm_head_w.shape[1]

    # tile sizes: big enough to feed the MXU, clamped for tiny demo shapes
    tt = min(tile_tokens, _round_up(T, 16))
    tv = min(tile_vocab, _round_up(V, 128))
    T_pad = _round_up(T, tt)
    V_pad = _round_up(V, tv)

    labels = labels.astype(jnp.int32)
    if T_pad != T:
        hidden = jnp.pad(hidden, ((0, T_pad - T), (0, 0)))
        labels = jnp.pad(labels, (0, T_pad - T), constant_values=IGNORE_INDEX)
    if V_pad != V:
        lm_head_w = jnp.pad(lm_head_w, ((0, 0), (0, V_pad - V)))

    labels2d = labels.reshape(T_pad, 1)
    nt, nv = T_pad // tt, V_pad // tv

    kernel = functools.partial(_mlm_ce_kernel, v_actual=V, tile_v=tv,
                               needs_vocab_mask=(V_pad != V))
    partials = pl.pallas_call(
        kernel,
        out_shape=jax.ShapeDtypeStruct((nt, 8, 128), jnp.float32),
        grid_spec=pltpu.PrefetchScalarGridSpec(
            num_scalar_prefetch=0,
            grid=(nt, nv),
            in_specs=[
                pl.BlockSpec((tt, H), lambda t, kv: (t, 0)),
                pl.BlockSpec((H, tv), lambda t, kv: (0, kv)),   # streamed weight
                pl.BlockSpec((tt, 1), lambda t, kv: (t, 0)),
            ],
            out_specs=pl.BlockSpec((1, 8, 128), lambda t, kv: (t, 0, 0)),
            scratch_shapes=[pltpu.VMEM((tt, 1), jnp.float32),   # running max
                            pltpu.VMEM((tt, 1), jnp.float32),   # running sum
                            pltpu.VMEM((tt, 1), jnp.float32)],  # picked logit
        ),
        compiler_params=pltpu.CompilerParams(
            dimension_semantics=("parallel", "arbitrary"),
            vmem_limit_bytes=vmem_limit),
    )(hidden, lm_head_w, labels2d)

    loss_sum = jnp.sum(partials[:, 0, 0])
    cnt = jnp.sum((labels != IGNORE_INDEX).astype(jnp.float32))
    # NOTE: returns 0 (not NaN) when every label is IGNORE_INDEX.
    return loss_sum / jnp.maximum(cnt, 1.0)


# --------------------------------------------------------------------------
# Kernel 2: mae_proj (hidden -> 1176*4) + masked MSE (MAE loss)
# Grid = (patch_tiles [parallel], hidden_contraction [arbitrary]); the (th, P)
# weight slab is streamed over the contraction axis, pred accumulated in a
# (tn, P) f32 VMEM scratch, bias/MSE applied on the last contraction step.
# --------------------------------------------------------------------------
def _mae_kernel(h_ref, w_ref, b_ref, pix_ref, mask_ref, out_ref, acc_ref):
    k = pl.program_id(1)

    @pl.when(k == 0)
    def _():
        acc_ref[...] = jnp.zeros_like(acc_ref)

    acc_ref[...] += jnp.dot(h_ref[...], w_ref[...],
                            preferred_element_type=jnp.float32)     # (tn, P)

    @pl.when(k == pl.num_programs(1) - 1)
    def _():
        pred = acc_ref[...] + b_ref[...]
        diff = pred - pix_ref[...].astype(jnp.float32)
        per_row = jnp.sum(diff * diff, axis=-1, keepdims=True) * mask_ref[...]
        out_ref[...] = jnp.full(out_ref.shape, jnp.sum(per_row), dtype=jnp.float32)


def mae_masked_mse(vis_hidden, mae_w, mae_b, pixel_labels, mae_pred_mask, *,
                   tile_n=256, vmem_limit=None):
    """vis_hidden: (N, H) bf16, mae_w: (H, P) bf16, mae_b: (1, P) f32,
    pixel_labels: (N, P), mae_pred_mask: (N,) -> masked mean-squared error
    (mean over masked-patch elements, i.e. divided by sum(mask) * P)."""
    if vmem_limit is None:
        vmem_limit = 48 * 1024 * 1024

    N, H = vis_hidden.shape
    P = mae_w.shape[1]

    # patch tile: bf16 sublane granularity (16); contraction tile over H.
    tn = min(tile_n, _round_up(N, 16))
    N_pad = _round_up(N, tn)
    th = H
    for cand in (512, 256, 128):
        if H % cand == 0:
            th = cand
            break
    nk = H // th

    # pad P to a lane multiple so stores/loads on the wide dim are unmasked.
    P_pad = _round_up(P, 128)

    mask = mae_pred_mask.reshape(N).astype(jnp.float32)
    pix = pixel_labels                                   # keep native dtype
    mae_b = mae_b.astype(jnp.float32)
    if P_pad != P:
        mae_w = jnp.pad(mae_w, ((0, 0), (0, P_pad - P)))
        mae_b = jnp.pad(mae_b, ((0, 0), (0, P_pad - P)))
        pix = jnp.pad(pix, ((0, 0), (0, P_pad - P)))
    if N_pad != N:
        vis_hidden = jnp.pad(vis_hidden, ((0, N_pad - N), (0, 0)))
        pix = jnp.pad(pix, ((0, N_pad - N), (0, 0)))
        mask_p = jnp.pad(mask, (0, N_pad - N))
    else:
        mask_p = mask
    nt = N_pad // tn

    partials = pl.pallas_call(
        _mae_kernel,
        out_shape=jax.ShapeDtypeStruct((nt, 8, 128), jnp.float32),
        grid_spec=pltpu.PrefetchScalarGridSpec(
            num_scalar_prefetch=0,
            grid=(nt, nk),
            in_specs=[
                pl.BlockSpec((tn, th), lambda n, k: (n, k)),
                pl.BlockSpec((th, P_pad), lambda n, k: (k, 0)),   # streamed weight
                pl.BlockSpec((1, P_pad), lambda n, k: (0, 0)),
                pl.BlockSpec((tn, P_pad), lambda n, k: (n, 0)),   # pixel targets
                pl.BlockSpec((tn, 1), lambda n, k: (n, 0)),
            ],
            out_specs=pl.BlockSpec((1, 8, 128), lambda n, k: (n, 0, 0)),
            scratch_shapes=[pltpu.VMEM((tn, P_pad), jnp.float32)],  # pred accum
        ),
        compiler_params=pltpu.CompilerParams(
            dimension_semantics=("parallel", "arbitrary"),
            vmem_limit_bytes=vmem_limit),
    )(vis_hidden, mae_w, mae_b, pix, mask_p.reshape(N_pad, 1))

    loss_sum = jnp.sum(partials[:, 0, 0])
    cnt = jnp.sum(mask) * float(P)
    return loss_sum / jnp.maximum(cnt, 1.0)


# --------------------------------------------------------------------------
# Model wrapper reproducing MMEBModelForMLMMAE.forward control flow
# --------------------------------------------------------------------------
class MMEBModelForMLMMAE:
    def __init__(self, params, use_mae=True, use_mlm=True, mae_loss_weight=0.5):
        self.params = params
        self.use_mae = use_mae
        self.use_mlm = use_mlm
        self.mae_loss_weight = mae_loss_weight

    def _encoder(self, input_ids, attention_mask, pixel_values,
                 image_grid_thw, labels, pixel_labels, mae_pred_mask):
        p = self.params
        B, S = input_ids.shape
        H = p["tok_emb"].shape[1]

        # --- synthetic hidden states (glue; real VLM backbone not in-module) ---
        # TODO(synk): Qwen2.5-VL attention stack / vision merger not translated.
        text_hidden = p["tok_emb"][input_ids].reshape(B * S, H)          # (T, H) bf16
        text_hidden = text_hidden * attention_mask.reshape(B * S, 1).astype(text_hidden.dtype)
        vis_hidden = jnp.dot(pixel_values.astype(jnp.bfloat16),
                             p["patch_embed"]).astype(jnp.bfloat16)      # (N, H) bf16

        mlm_loss = None
        if labels is not None:
            mlm_loss = fused_lm_head_cross_entropy(
                text_hidden, p["lm_head"], labels.reshape(-1))

        mae_loss = None
        if pixel_labels is not None:
            mae_loss = mae_masked_mse(
                vis_hidden, p["mae_w"], p["mae_b"], pixel_labels, mae_pred_mask)

        return {"loss": mlm_loss, "mae_loss": mae_loss}

    def __call__(self, input_ids=None, attention_mask=None, pixel_values=None,
                 image_grid_thw=None, labels=None, pixel_labels=None,
                 mae_pred_mask=None, pixel_values_masked=None, **kwargs):
        outputs = self._encoder(
            input_ids=input_ids,
            attention_mask=attention_mask,
            pixel_values=pixel_values_masked if pixel_values_masked is not None else pixel_values,
            image_grid_thw=image_grid_thw,
            labels=labels if self.use_mlm else None,
            pixel_labels=pixel_labels if self.use_mae else None,
            mae_pred_mask=mae_pred_mask if self.use_mae else None,
        )
        mlm_loss = outputs.get("loss", None)
        mae_loss = outputs.get("mae_loss", None)
        if self.use_mae and self.use_mlm:
            total_loss = mlm_loss + self.mae_loss_weight * mae_loss
            return {"loss": total_loss, "mlm_loss": mlm_loss, "mae_loss": mae_loss}
        elif self.use_mae:
            return {"loss": mae_loss, "mae_loss": mae_loss}
        else:
            return {"loss": mlm_loss, "mlm_loss": mlm_loss}


def init_params(key, hidden_size=32, vocab_size=256, mae_out=1176 * 4):
    """Deterministic synthetic parameters (shapes per init_weights / config)."""
    k1, k2, k3, k4 = jax.random.split(key, 4)
    tok_emb = (0.02 * jax.random.normal(k1, (vocab_size, hidden_size))).astype(jnp.bfloat16)
    lm_head = (0.02 * jax.random.normal(k2, (hidden_size, vocab_size))).astype(jnp.bfloat16)
    patch_embed = (0.02 * jax.random.normal(k3, (mae_out, hidden_size))).astype(jnp.bfloat16)
    # mae_proj.weight in PyTorch is (1176*4, hidden_size); stored transposed here.
    mae_w = (0.02 * jax.random.normal(k4, (hidden_size, mae_out))).astype(jnp.bfloat16)
    mae_b = jnp.zeros((1, mae_out), jnp.float32)
    return {"tok_emb": tok_emb, "lm_head": lm_head, "patch_embed": patch_embed,
            "mae_w": mae_w, "mae_b": mae_b}


if __name__ == "__main__":
    B, S, H, V = 2, 8, 32, 256
    N_PATCH, P = 8, 1176 * 4

    root = jax.random.PRNGKey(0)
    kp, k_ids, k_pix, k_lab = jax.random.split(root, 4)

    params = init_params(kp, hidden_size=H, vocab_size=V, mae_out=P)
    model = MMEBModelForMLMMAE(params, use_mae=True, use_mlm=True, mae_loss_weight=0.5)

    input_ids = jax.random.randint(k_ids, (B, S), 0, V, dtype=jnp.int32)
    attention_mask = jnp.ones((B, S), jnp.int32)
    pixel_values = jax.random.normal(k_pix, (N_PATCH, P), jnp.float32)
    mae_pred_mask = jnp.array([1, 1, 1, 1, 0, 0, 0, 0], jnp.float32)       # masked patches
    pixel_values_masked = pixel_values * (1.0 - mae_pred_mask)[:, None]
    pixel_labels = pixel_values                                            # reconstruction targets
    raw_labels = jax.random.randint(k_lab, (B, S), 0, V, dtype=jnp.int32)
    labels = jnp.where((jnp.arange(B * S).reshape(B, S) % 3) == 0,
                       IGNORE_INDEX, raw_labels)                            # some ignored tokens
    image_grid_thw = jnp.array([[1, 2, 4]], jnp.int32)                      # unused placeholder

    out = model(input_ids=input_ids,
                attention_mask=attention_mask,
                pixel_values=pixel_values,
                image_grid_thw=image_grid_thw,
                labels=labels,
                pixel_labels=pixel_labels,
                mae_pred_mask=mae_pred_mask,
                pixel_values_masked=pixel_values_masked)

    jax.block_until_ready(out["loss"])
    jax.block_until_ready(out["mlm_loss"])
    jax.block_until_ready(out["mae_loss"])
    print("KERNEL_OK")
</pallas_src>

<mosaic_0001>
module attributes {stable_mosaic.version = 11 : i64} {
  func.func @_mlm_ce_kernel(%arg0: i32, %arg1: i32, %arg2: memref<16x32xbf16, #tpu.memory_space<vmem>>, %arg3: memref<32x256xbf16, #tpu.memory_space<vmem>>, %arg4: memref<16x1xi32, #tpu.memory_space<vmem>>, %arg5: memref<1x8x128xf32, #tpu.memory_space<vmem>>, %arg6: memref<16x1xf32, #tpu.memory_space<vmem>>, %arg7: memref<16x1xf32, #tpu.memory_space<vmem>>, %arg8: memref<16x1xf32, #tpu.memory_space<vmem>>) attributes {dimension_semantics = [#tpu.dimension_semantics<parallel>, #tpu.dimension_semantics<arbitrary>], iteration_bounds = array<i64: 1, 1>, scalar_prefetch = 0 : i64, scratch_operands = 3 : i64, tpu.core_type = #tpu.core_type<tc>, window_params = [{transform_indices = @transform_0, window_bounds = array<i64: 16, 32>}, {transform_indices = @transform_1, window_bounds = array<i64: 32, 256>}, {transform_indices = @transform_2, window_bounds = array<i64: 16, 1>}, {transform_indices = @transform_3, window_bounds = array<i64: 1, 8, 128>}]} {
    %c0_i32 = arith.constant 0 : i32
    %0 = arith.cmpi eq, %arg1, %c0_i32 : i32
    %1 = arith.extui %0 : i1 to i32
    %c0_i32_0 = arith.constant 0 : i32
    %2 = arith.cmpi ne, %1, %c0_i32_0 : i32
    scf.if %2 {
      %cst_24 = arith.constant 0xFF800000 : f32
      %40 = vector.broadcast %cst_24 : f32 to vector<16x1xf32>
      %c0_25 = arith.constant 0 : index
      %c0_26 = arith.constant 0 : index
      %41 = vector.load %arg6[%c0_25, %c0_26] : memref<16x1xf32, #tpu.memory_space<vmem>>, vector<16x1xf32>
      tpu.vector_store %arg6[%c0_25, %c0_26], %40 {strides = array<i32>} : memref<16x1xf32, #tpu.memory_space<vmem>>, vector<16x1xf32>,
      %cst_27 = arith.constant 0.000000e+00 : f32
      %42 = vector.broadcast %cst_27 : f32 to vector<16x1xf32>
      %c0_28 = arith.constant 0 : index
      %c0_29 = arith.constant 0 : index
      %43 = vector.load %arg7[%c0_28, %c0_29] : memref<16x1xf32, #tpu.memory_space<vmem>>, vector<16x1xf32>
      tpu.vector_store %arg7[%c0_28, %c0_29], %42 {strides = array<i32>} : memref<16x1xf32, #tpu.memory_space<vmem>>, vector<16x1xf32>,
      %cst_30 = arith.constant 0.000000e+00 : f32
      %44 = vector.broadcast %cst_30 : f32 to vector<16x1xf32>
      %c0_31 = arith.constant 0 : index
      %c0_32 = arith.constant 0 : index
      %45 = vector.load %arg8[%c0_31, %c0_32] : memref<16x1xf32, #tpu.memory_space<vmem>>, vector<16x1xf32>
      tpu.vector_store %arg8[%c0_31, %c0_32], %44 {strides = array<i32>} : memref<16x1xf32, #tpu.memory_space<vmem>>, vector<16x1xf32>,
    } else {
    }
    %c0 = arith.constant 0 : index
    %c0_1 = arith.constant 0 : index
    %3 = vector.load %arg2[%c0, %c0_1] : memref<16x32xbf16, #tpu.memory_space<vmem>>, vector<16x32xbf16>
    %c0_2 = arith.constant 0 : index
    %c0_3 = arith.constant 0 : index
    %4 = vector.load %arg3[%c0_2, %c0_3] : memref<32x256xbf16, #tpu.memory_space<vmem>>, vector<32x256xbf16>
    %cst = arith.constant dense<0.000000e+00> : vector<16x256xf32>
    %5 = tpu.matmul %3, %4, %cst {dimension_numbers = #tpu.dot_dimension_numbers<[1], [0], [0], [1], [0, 0, 1, 1], [], []>} : vector<16x32xbf16>, vector<32x256xbf16>, vector<16x256xf32> -> vector<16x256xf32>
    %6 = tpu.iota {dimensions = array<i32: 1>} : vector<1x256xi32>
    %c0_4 = arith.constant 0 : index
    %c0_5 = arith.constant 0 : index
    %7 = vector.load %arg4[%c0_4, %c0_5] : memref<16x1xi32, #tpu.memory_space<vmem>>, vector<16x1xi32>
    %c0_6 = arith.constant 0 : index
    %c0_7 = arith.constant 0 : index
    %8 = vector.load %arg6[%c0_6, %c0_7] : memref<16x1xf32, #tpu.memory_space<vmem>>, vector<16x1xf32>
    %cst_8 = arith.constant dense<0xFF800000> : vector<16xf32>
    %9 = vector.multi_reduction <maximumf>, %5, %cst_8 [1] : vector<16x256xf32> to vector<16xf32>
    %10 = vector.shape_cast %9 : vector<16xf32> to vector<16x1xf32>
    %11 = arith.maximumf %8, %10 : vector<16x1xf32>
    %c0_9 = arith.constant 0 : index
    %c0_10 = arith.constant 0 : index
    %12 = vector.load %arg7[%c0_9, %c0_10] : memref<16x1xf32, #tpu.memory_space<vmem>>, vector<16x1xf32>
    %13 = arith.subf %8, %11 : vector<16x1xf32>
    %14 = math.exp %13 : vector<16x1xf32>
    %15 = arith.mulf %12, %14 : vector<16x1xf32>
    %16 = vector.broadcast %11 : vector<16x1xf32> to vector<16x256xf32>
    %17 = arith.subf %5, %16 : vector<16x256xf32>
    %18 = math.exp %17 : vector<16x256xf32>
    %cst_11 = arith.constant dense<0.000000e+00> : vector<16xf32>
    %19 = vector.multi_reduction <add>, %18, %cst_11 [1] : vector<16x256xf32> to vector<16xf32>
    %20 = vector.shape_cast %19 : vector<16xf32> to vector<16x1xf32>
    %21 = arith.addf %15, %20 : vector<16x1xf32>
    %c0_12 = arith.constant 0 : index
    %c0_13 = arith.constant 0 : index
    %22 = vector.load %arg7[%c0_12, %c0_13] : memref<16x1xf32, #tpu.memory_space<vmem>>, vector<16x1xf32>
    tpu.vector_store %arg7[%c0_12, %c0_13], %21 {strides = array<i32>} : memref<16x1xf32, #tpu.memory_space<vmem>>, vector<16x1xf32>,
    %c256_i32 = arith.constant 256 : i32
    %23 = arith.muli %arg1, %c256_i32 : i32
    %24 = vector.broadcast %23 : i32 to vector<16x1xi32>
    %25 = arith.subi %7, %24 : vector<16x1xi32>
    %26 = vector.broadcast %6 : vector<1x256xi32> to vector<16x256xi32>
    %27 = vector.broadcast %25 : vector<16x1xi32> to vector<16x256xi32>
    %28 = arith.cmpi eq, %26, %27 : vector<16x256xi32>
    %c0_14 = arith.constant 0 : index
    %c0_15 = arith.constant 0 : index
    %29 = vector.load %arg8[%c0_14, %c0_15] : memref<16x1xf32, #tpu.memory_space<vmem>>, vector<16x1xf32>
    %cst_16 = arith.constant 0.000000e+00 : f32
    %30 = vector.broadcast %cst_16 : f32 to vector<16x256xf32>
    %31 = arith.select %28, %5, %30 : vector<16x256xi1>, vector<16x256xf32>
    %cst_17 = arith.constant dense<0.000000e+00> : vector<16xf32>
    %32 = vector.multi_reduction <add>, %31, %cst_17 [1] : vector<16x256xf32> to vector<16xf32>
    %33 = vector.shape_cast %32 : vector<16xf32> to vector<16x1xf32>
    %34 = arith.addf %29, %33 : vector<16x1xf32>
    %c0_18 = arith.constant 0 : index
    %c0_19 = arith.constant 0 : index
    %35 = vector.load %arg8[%c0_18, %c0_19] : memref<16x1xf32, #tpu.memory_space<vmem>>, vector<16x1xf32>
    tpu.vector_store %arg8[%c0_18, %c0_19], %34 {strides = array<i32>} : memref<16x1xf32, #tpu.memory_space<vmem>>, vector<16x1xf32>,
    %c0_20 = arith.constant 0 : index
    %c0_21 = arith.constant 0 : index
    %36 = vector.load %arg6[%c0_20, %c0_21] : memref<16x1xf32, #tpu.memory_space<vmem>>, vector<16x1xf32>
    tpu.vector_store %arg6[%c0_20, %c0_21], %11 {strides = array<i32>} : memref<16x1xf32, #tpu.memory_space<vmem>>, vector<16x1xf32>,
    %c0_i32_22 = arith.constant 0 : i32
    %37 = arith.cmpi eq, %arg1, %c0_i32_22 : i32
    %38 = arith.extui %37 : i1 to i32
    %c0_i32_23 = arith.constant 0 : i32
    %39 = arith.cmpi ne, %38, %c0_i32_23 : i32
    scf.if %39 {
      %c-100_i32 = arith.constant -100 : i32
      %40 = vector.broadcast %c-100_i32 : i32 to vector<16x1xi32>
      %41 = arith.cmpi ne, %7, %40 : vector<16x1xi32>
      %42 = arith.extui %41 : vector<16x1xi1> to vector<16x1xi32>
      %43 = arith.sitofp %42 : vector<16x1xi32> to vector<16x1xf32>
      %c0_24 = arith.constant 0 : index
      %c0_25 = arith.constant 0 : index
      %44 = vector.load %arg6[%c0_24, %c0_25] : memref<16x1xf32, #tpu.memory_space<vmem>>, vector<16x1xf32>
      %c0_26 = arith.constant 0 : index
      %c0_27 = arith.constant 0 : index
      %45 = vector.load %arg7[%c0_26, %c0_27] : memref<16x1xf32, #tpu.memory_space<vmem>>, vector<16x1xf32>
      %46 = math.log %45 : vector<16x1xf32>
      %47 = arith.addf %44, %46 : vector<16x1xf32>
      %c0_28 = arith.constant 0 : index
      %c0_29 = arith.constant 0 : index
      %48 = vector.load %arg8[%c0_28, %c0_29] : memref<16x1xf32, #tpu.memory_space<vmem>>, vector<16x1xf32>
      %49 = arith.subf %47, %48 : vector<16x1xf32>
      %50 = arith.mulf %49, %43 : vector<16x1xf32>
      %51 = vector.shape_cast %50 : vector<16x1xf32> to vector<1x16x1xf32>
      %cst_30 = arith.constant dense<0.000000e+00> : vector<1xf32>
      %52 = vector.multi_reduction <add>, %51, %cst_30 [1, 2] : vector<1x16x1xf32> to vector<1xf32>
      %53 = vector.shape_cast %52 : vector<1xf32> to vector<1x1x1xf32>
      %54 = vector.extract %53[0, 0, 0] : f32 from vector<1x1x1xf32>
      %55 = vector.broadcast %54 : f32 to vector<1x8x128xf32>
      %c0_31 = arith.constant 0 : index
      %c0_32 = arith.constant 0 : index
      %c0_33 = arith.constant 0 : index
      %56 = vector.load %arg5[%c0_31, %c0_32, %c0_33] : memref<1x8x128xf32, #tpu.memory_space<vmem>>, vector<1x8x128xf32>
      tpu.vector_store %arg5[%c0_31, %c0_32, %c0_33], %55 {strides = array<i32>} : memref<1x8x128xf32, #tpu.memory_space<vmem>>, vector<1x8x128xf32>,
    } else {
    }
    return
  }
  func.func @transform_0(%arg0: i32, %arg1: i32) -> (i32, i32) {
    %c0_i32 = arith.constant 0 : i32
    %c0_i32_0 = arith.constant 0 : i32
    return %arg0, %c0_i32 : i32, i32
  }
  func.func @transform_1(%arg0: i32, %arg1: i32) -> (i32, i32) {
    %c0_i32 = arith.constant 0 : i32
    %c0_i32_0 = arith.constant 0 : i32
    return %c0_i32, %arg1 : i32, i32
  }
  func.func @transform_2(%arg0: i32, %arg1: i32) -> (i32, i32) {
    %c0_i32 = arith.constant 0 : i32
    %c0_i32_0 = arith.constant 0 : i32
    return %arg0, %c0_i32 : i32, i32
  }
  func.func @transform_3(%arg0: i32, %arg1: i32) -> (i32, i32, i32) {
    %c0_i32 = arith.constant 0 : i32
    %c0_i32_0 = arith.constant 0 : i32
    %c0_i32_1 = arith.constant 0 : i32
    return %arg0, %c0_i32, %c0_i32_0 : i32, i32, i32
  }
}

</mosaic_0001>

<bundles_post_ra>
// kernel: tpu_custom_call.1
= control target key start
LH: loop header
LB: loop body
LE: loop exit
PB: predicated region body
PF: predicated region fallthrough
CT: control target
= control target key end

     0   :  { %8 = vsyncpa [#allocation6], 0  ;;  %s419_s0 = inlined_call_operand.vmem [shape: bf16[16,32], index: 0, kind: input, shape index: {}]   ;;  %s420_s1 = inlined_call_operand.hbm [shape: bf16[32,256], index: 1, kind: input, shape index: {}]   ;;  %s421_s2 = inlined_call_operand.vmem [shape: s32[16,1], index: 2, kind: input, shape index: {}]   ;;  %s422_s3 = inlined_call_operand.hbm [shape: f32[1,8,128], index: 3, kind: output, shape index: {}]  }
   0x1   :  { %9 = vsyncpa [#allocation7], 0  ;;  %s349_s12 = smov [#allocation5]  }
   0x2   :  { %s17_s13 = sshll.u32 %s349_s12, 4  ;;  %s18_s13 = int_to_ptr.vmem [resolvable:$true] %s17_s13 }
   0x3   :  { %s313_s14 = scalar_lea.vmem %s18_s13, 512  ;;  %p318_p1 = scmp.lt.s32.totalorder %s18_s13, %s18_s13 }
   0x4   :  { %p314_p0 = scmp.ne.s32.totalorder %s18_s13, %s313_s14  ;;  %p319_p2 = scmp.lt.s32.totalorder %s313_s14, %s313_s14 }
   0x6   :  { %p320_p3 = por %p319_p2, %p318_p1 }
   0x8   :  { %p321_p4 = pnand %p320_p3, %p314_p0 }
   0xa   :  { %324 = shalt.err (!%p321_p4)
}
   0xb   :  { %s350_s15 = smov 128   ;;  %s351_s16 = smov 8  }
   0xc   :  { %23 = dma.hbm_to_vmem [thread:$0]  %s420_s1, 512, %s18_s13, [#allocation6], %s350_s15, %s350_s15, %s351_s16  }
   0xd   :  { %345 = dma.done.wait [#allocation6], 512  }
   0xe   :  { %346 = vsyncadd [#allocation6], 4294966784  ;;  %v352_v0 = vmov 0   ;;  %v282_v1 = vld [vmem:[#allocation5 + $0x14] ss:$8 sps:$4 sm:$0xff]   ;;  %vm72_vm0 = vcmask 261120   ;;  %v119_v18 = vlaneseq }
   0xf   :  { %108 = vmatprep.mubr.bf16.mxu0 %v352_v0  ;;  %281 = vset.pattern.permute.xlu0 %v352_v0  ;;  %v284_v2 = vld [vmem:[#allocation5 + $0x10] ss:$8 sps:$4 sm:$0xff]   ;;  %v285_v3 = vld [vmem:[#allocation5 + $0x4] ss:$8 sps:$4 sm:$0xff]   ;;  %v287_v4 = vld [vmem:[#allocation5] ss:$8 sps:$4 sm:$0xff]  }
  0x10   :  { %280 = vset.pattern.permute.xlu1 %v352_v0  ;;  %88 = vmatprep.subr.bf16.mxu0 %v282_v1  ;;  %v288_v5 = vld [vmem:[%s419_s0] sm:$0xff]   ;;  %vm34_vm1 = vcmask 7168   ;;  %v353_v6 = vmov -inf   ;;  %v354_v7 = vmov 0.0   ;;  %v120_v23 = vand.u32 127, %v119_v18  ;;  %v403_v25 = vld [vmem:[%s421_s2 + $0x8] sm:$0xff] }
  0x11   :  { %89 = vmatpush1.bf16.msra.mxu0 %v284_v2  ;;  %35 = vst.msk [vmem:[#allocation2] sm:$0xff] %vm34_vm1, %v353_v6  ;;  %36 = vst.msk [vmem:[#allocation2 + $0x8] sm:$0xff] %vm34_vm1, %v353_v6  ;;  %v395_v14 = vld [vmem:[%s421_s2] sm:$0xff]  ;;  %vm213_vm7 = vcmp.ne.s32.totalorder %v403_v25, 4294967196  ;;  %s355_s2 = smov [#allocation8]  }
  0x12   :  { %90 = vmatprep.subr.bf16.mxu0 %v285_v3  ;;  %37 = vst.msk [vmem:[#allocation3] sm:$0xff] %vm34_vm1, %v354_v7  ;;  %38 = vst.msk [vmem:[#allocation3 + $0x8] sm:$0xff] %vm34_vm1, %v354_v7  ;;  %v121_v26 = vadd.s32 128, %v120_v23  ;;  %vm212_vm6 = vcmp.ne.s32.totalorder %v395_v14, 4294967196  ;;  %s254_s23 = sshll.u32 %s355_s2, 4  ;;  %s255_s23 = int_to_ptr.vmem [resolvable:$true] %s254_s23 }
  0x13   :  { %39 = vst.msk [vmem:[#allocation4] sm:$0xff] %vm34_vm1, %v354_v7  ;;  %40 = vst.msk [vmem:[#allocation4 + $0x8] sm:$0xff] %vm34_vm1, %v354_v7  ;;  %s325_s25 = scalar_lea.vmem %s255_s23, 128  ;;  %p330_p6 = scmp.lt.s32.totalorder %s255_s23, %s255_s23 }
  0x14   :  { %p326_p5 = scmp.ne.s32.totalorder %s255_s23, %s325_s25  ;;  %p331_p7 = scmp.lt.s32.totalorder %s325_s25, %s325_s25 }
  0x15   :  { %91 = vmatpush1.bf16.msra.mxu0 %v287_v4 }
  0x16   :  { %p332_p8 = por %p331_p7, %p330_p6 }
  0x18   :  { %268 = vmatmul.mubr.msk.bf16.vlgmr.msra.gmra.mxu0 %vm72_vm0, %v288_v5  ;;  %v124_v15 = vld [vmem:[#allocation2] sm:$0xff]  ;;  %v125_v19 = vld [vmem:[#allocation2 + $0x8] sm:$0xff]  ;;  %p333_p9 = pnand %p332_p8, %p326_p5 }
  0x19   :  { %v134_v57 = vld [vmem:[#allocation3] sm:$0xff]  ;;  %v135_v61 = vld [vmem:[#allocation3 + $0x8] sm:$0xff] }
  0x1a   :  { %v191_v50 = vld [vmem:[#allocation4] sm:$0xff]  ;;  %v192_v2 = vld [vmem:[#allocation4 + $0x8] sm:$0xff] }
  0xd8   :  { %v110_v8 = vpop.f32.mrf.mxu0 }
  0xda   :  { %v112_v9 = vpop.f32.mrf.mxu0 }
  0xdb   :  { %v126_v10 = vmax.f32 %v110_v8, %v112_v9 }
  0xdc   :  { %v114_v11 = vpop.f32.mrf.mxu0 }
  0xdd   :  { %127 = vmax.xlane.f32.xlu0 %v126_v10 }
  0xde   :  { %v116_v12 = vpop.f32.mrf.mxu0 }
  0xdf   :  { %v129_v13 = vmax.f32 %v114_v11, %v116_v12 }
  0xe1   :  { %130 = vmax.xlane.f32.xlu0 %v129_v13 }
  0xf7   :  { %182 = vperm.xlu0 %281, %v395_v14  }
 0x166   :  { %v128_v16 = vpop.xlane.xlu0 %127 }
 0x167   :  { %v132_v17 = vmax.f32 %v124_v15, %v128_v16 }
 0x169   :  { %v136_v20 = vsub.f32 %v124_v15, %v132_v17  ;;  %207 = vst.msk [vmem:[#allocation2] sm:$0xff] %vm34_vm1, %v132_v17  ;;  %146 = vperm.xlu1 %280, %v132_v17   ;;  %v269_v17 = vsel %vm212_vm6, 1.0, %v354_v7 }
 0x16a   :  { %v131_v21 = vpop.xlane.xlu0 %130 }
 0x16b   :  { %v133_v22 = vmax.f32 %v125_v19, %v131_v21  ;;  %v138_v54 = vmul.f32 1.442695, %v136_v20  ;;  %v270_v20 = vsel %vm213_vm7, 1.0, %v354_v7 }
 0x16d   :  { %v137_v24 = vsub.f32 %v125_v19, %v133_v22  ;;  %208 = vst.msk [vmem:[#allocation2 + $0x8] sm:$0xff] %vm34_vm1, %v133_v22  ;;  %151 = vperm.xlu1 %280, %v133_v22  }
 0x16f   :  { %v140_v55 = vmul.f32 1.442695, %v137_v24 }
 0x170   :  { %v218_v10 = vld [vmem:[#allocation2] sm:$0xff] }
 0x171   :  { %185 = vperm.xlu1 %280, %v403_v25  }
 0x172   :  { %v183_v27 = vpop.permute.xlu0 %182 }
 0x173   :  { %vm187_vm2 = vcmp.eq.s32.totalorder %v120_v23, %v183_v27  ;;  %vm188_vm3 = vcmp.eq.s32.totalorder %v121_v26, %v183_v27 }
 0x174   :  { %v193_v28 = vsel %vm187_vm2, %v110_v8, 0.0  ;;  %v194_v29 = vsel %vm188_vm3, %v112_v9, 0.0  ;;  %v219_v18 = vld [vmem:[#allocation2 + $0x8] sm:$0xff] }
 0x175   :  { %v197_v30 = vadd.f32 %v194_v29, %v193_v28 }
 0x177   :  { %198 = vadd.xlane.f32.xlu0 %v197_v30 }
 0x1e4   :  { %v147_v31 = vpop.permute.xlu1 %146 }
 0x1e5   :  { %v154_v32 = vsub.f32 %v110_v8, %v147_v31  ;;  %v155_v33 = vsub.f32 %v112_v9, %v147_v31 }
 0x1e7   :  { %v158_v34 = vmul.f32 1.442695, %v154_v32  ;;  %v160_v35 = vmul.f32 1.442695, %v155_v33 }
 0x1e8   :  { %v152_v36 = vpop.permute.xlu1 %151 }
 0x1e9   :  { %289 = vpow2.f32 %v158_v34  ;;  %v156_v37 = vsub.f32 %v114_v11, %v152_v36  ;;  %v157_v38 = vsub.f32 %v116_v12, %v152_v36 }
 0x1ea   :  { %291 = vpow2.f32 %v160_v35 }
 0x1eb   :  { %v162_v39 = vmul.f32 1.442695, %v156_v37  ;;  %v164_v40 = vmul.f32 1.442695, %v157_v38 }
 0x1ec   :  { %v186_v43 = vpop.permute.xlu1 %185 }
 0x1ed   :  { %293 = vpow2.f32 %v162_v39  ;;  %vm189_vm4 = vcmp.eq.s32.totalorder %v120_v23, %v186_v43  ;;  %vm190_vm5 = vcmp.eq.s32.totalorder %v121_v26, %v186_v43 }
 0x1ee   :  { %295 = vpow2.f32 %v164_v40  ;;  %v195_v48 = vsel %vm189_vm4, %v114_v11, 0.0  ;;  %v196_v49 = vsel %vm190_vm5, %v116_v12, 0.0 }
 0x1ef   :  { %v200_v52 = vadd.f32 %v196_v49, %v195_v48  ;;  %297 = vpow2.f32 %v138_v54 }
 0x1f0   :  { %299 = vpow2.f32 %v140_v55 }
 0x1f6   :  { %v290_v41 = vpop.eup %289 }
 0x1f7   :  { %v292_v42 = vpop.eup %291 }
 0x1f8   :  { %v166_v44 = vadd.f32 %v292_v42, %v290_v41 }
 0x1fa   :  { %v294_v45 = vpop.eup %293  ;;  %167 = vadd.xlane.f32.xlu1 %v166_v44 }
 0x1fb   :  { %v296_v46 = vpop.eup %295 }
 0x1fc   :  { %v169_v47 = vadd.f32 %v296_v46, %v294_v45  ;;  %v298_v56 = vpop.eup %297 }
 0x1fd   :  { %v142_v58 = vmul.f32 %v298_v56, %v134_v57  ;;  %v300_v59 = vpop.eup %299 }
 0x1fe   :  { %170 = vadd.xlane.f32.xlu1 %v169_v47  ;;  %v143_v63 = vmul.f32 %v300_v59, %v135_v61 }
 0x200   :  { %v199_v51 = vpop.xlane.xlu0 %198 }
 0x201   :  { %v203_v53 = vadd.f32 %v199_v51, %v191_v50 }
 0x202   :  { %201 = vadd.xlane.f32.xlu1 %v200_v52 }
 0x203   :  { %205 = vst.msk [vmem:[#allocation4] sm:$0xff] %vm34_vm1, %v203_v53 }
 0x20a   :  { %v228_v13 = vld [vmem:[#allocation4] sm:$0xff] }
 0x283   :  { %v168_v60 = vpop.xlane.xlu1 %167 }
 0x284   :  { %v172_v62 = vadd.f32 %v168_v60, %v142_v58 }
 0x286   :  { %175 = vst.msk [vmem:[#allocation3] sm:$0xff] %vm34_vm1, %v172_v62 }
 0x287   :  { %v171_v0 = vpop.xlane.xlu1 %170 }
 0x288   :  { %v173_v1 = vadd.f32 %v171_v0, %v143_v63 }
 0x28a   :  { %176 = vst.msk [vmem:[#allocation3 + $0x8] sm:$0xff] %vm34_vm1, %v173_v1 }
 0x28b   :  { %v202_v3 = vpop.xlane.xlu1 %201 }
 0x28c   :  { %v204_v4 = vadd.f32 %v202_v3, %v192_v2 }
 0x28d   :  { %v220_v5 = vld [vmem:[#allocation3] sm:$0xff] }
 0x28e   :  { %206 = vst.msk [vmem:[#allocation4 + $0x8] sm:$0xff] %vm34_vm1, %v204_v4  ;;  %301 = vlog2.f32 %v220_v5 }
 0x291   :  { %v221_v6 = vld [vmem:[#allocation3 + $0x8] sm:$0xff] }
 0x292   :  { %303 = vlog2.f32 %v221_v6 }
 0x295   :  { %v229_v21 = vld [vmem:[#allocation4 + $0x8] sm:$0xff] }
 0x29b   :  { %v302_v8 = vpop.eup %301 }
 0x29c   :  { %v223_v9 = vmul.f32 0.6931472, %v302_v8 }
 0x29e   :  { %v226_v11 = vadd.f32 %v223_v9, %v218_v10 }
 0x29f   :  { %v304_v12 = vpop.eup %303 }
 0x2a0   :  { %v225_v15 = vmul.f32 0.6931472, %v304_v12  ;;  %v230_v16 = vsub.f32 %v226_v11, %v228_v13 }
 0x2a2   :  { %v227_v19 = vadd.f32 %v225_v15, %v219_v18  ;;  %v232_v23 = vmul.f32 %v269_v17, %v230_v16 }
 0x2a4   :  { %v231_v22 = vsub.f32 %v227_v19, %v229_v21  ;;  %v234_v26 = vsel %vm34_vm1, %v232_v23, 0.0 }
 0x2a6   :  { %v233_v24 = vmul.f32 %v270_v20, %v231_v22 }
 0x2a8   :  { %v235_v14 = vsel %vm34_vm1, %v233_v24, 0.0 }
 0x2a9   :  { %v236_v27 = vadd.f32 %v235_v14, %v234_v26 }
 0x2ab   :  { %237 = vadd.xlane.f32.xlu1 %v236_v27 }
 0x334   :  { %v238_v28 = vpop.xlane.xlu1 %237 }
 0x335   :  { %v239_v25 = vrot.slane %v238_v28, 4 }
 0x337   :  { %v240_v29 = vadd.f32 %v239_v25, %v238_v28 }
 0x339   :  { %v241_v30 = vrot.slane %v240_v29, 2 }
 0x33b   :  { %v242_v31 = vadd.f32 %v241_v30, %v240_v29 }
 0x33d   :  { %v243_v32 = vrot.slane %v242_v31, 1 }
 0x33f   :  { %v244_v33 = vadd.f32 %v243_v32, %v242_v31 }
 0x341   :  { %271 = vpush %v244_v33 }
 0x372   :  { %s272_s24 = spop %271 }
 0x373   :  { %v246_v7 = vstv %s272_s24 }
 0x374   :  { %247 = vst [vmem:[#allocation8] sm:$0xff] %v246_v7 }
 0x375   :  { %336 = shalt.err (!%p333_p9)
}
 0x376   :  { %257 = dma.vmem_to_hbm [thread:$0]  %s255_s23, 128, %s422_s3, [#allocation7]  }
 0x377   :  { %347 = dma.done.wait [#allocation7], 128  }
 0x378   :  { %348 = vsyncadd [#allocation7], 4294967168 }
 0x379   :  { %261 = vsyncpa [#allocation6], 1 }
 0x37a   :  { %262 = vsyncpa [#allocation7], 1 }

</bundles_post_ra>
